<compile_context>
chip_gen: v6e
topology: v6e:2x2x1
jax: 0.10.0
libtpu: 0.0.40
codegen_flags: <defaults>
</compile_context>

<pallas_src>
import functools
import math

import jax
import jax.numpy as jnp
from jax.experimental import pallas as pl
from jax.experimental.pallas import tpu as pltpu

SQRT2 = math.sqrt(2.0)
NEG_SLOPE = 0.2


def _round_up(v, m):
    return ((v + m - 1) // m) * m


# ---------------------------------------------------------------------------
# Pallas kernel: accumulate (x_tile @ w_tile) over K, fused bias + activation
# ---------------------------------------------------------------------------
def _equal_linear_kernel(x_ref, w_ref, b_ref, o_ref, acc_ref, *, activation):
    k = pl.program_id(2)

    @pl.when(k == 0)
    def _init():
        acc_ref[...] = jnp.zeros_like(acc_ref)

    acc_ref[...] += jnp.dot(
        x_ref[...], w_ref[...], preferred_element_type=jnp.float32
    )

    @pl.when(k == pl.num_programs(2) - 1)
    def _finalize():
        y = acc_ref[...] + b_ref[...]  # (tile_m, tile_n) + (1, tile_n), f32
        if activation:
            # fused_leaky_relu: leaky_relu(x + b, 0.2) * sqrt(2)
            y = jnp.where(y >= 0.0, y, NEG_SLOPE * y) * SQRT2
        o_ref[...] = y.astype(o_ref.dtype)


# ---------------------------------------------------------------------------
# Wrapper: EqualLinear forward
# ---------------------------------------------------------------------------
def equal_linear(x, weight, bias=None, *, lr_mul=1.0, activation=None,
                 compute_dtype=None):
    """x: (..., in_dim); weight: (out_dim, in_dim); bias: (out_dim,) or None."""
    out_dim, in_dim = weight.shape
    lead_shape = x.shape[:-1]
    x2 = x.reshape(-1, in_dim)
    M, K = x2.shape
    N = out_dim
    out_dtype = x.dtype
    compute_dtype = compute_dtype or x.dtype

    # Equalized-LR scaling folded into the weight; bias in f32 for the epilogue.
    scale = (1.0 / math.sqrt(in_dim)) * lr_mul
    w_mat = (weight.astype(jnp.float32) * scale).T.astype(compute_dtype)  # (K, N)
    if bias is None:
        b_eff = jnp.zeros((N,), jnp.float32)
    else:
        b_eff = (bias.astype(jnp.float32) * lr_mul)

    # Shape-aware, hardware-aligned tiles (8 sublanes / 128 lanes), padded so the
    # grid divides exactly (no asserts, no masked stores).
    tile_m = min(512, _round_up(M, 8))
    tile_k = min(512, _round_up(K, 128))
    tile_n = min(256, _round_up(N, 128))
    M_pad = _round_up(M, tile_m)
    K_pad = _round_up(K, tile_k)
    N_pad = _round_up(N, tile_n)

    x_p = jnp.pad(x2.astype(compute_dtype), ((0, M_pad - M), (0, K_pad - K)))
    w_p = jnp.pad(w_mat, ((0, K_pad - K), (0, N_pad - N)))
    b_p = jnp.pad(b_eff, (0, N_pad - N)).reshape(1, N_pad)

    grid = (M_pad // tile_m, N_pad // tile_n, K_pad // tile_k)
    kernel = functools.partial(_equal_linear_kernel, activation=bool(activation))

    itm = jnp.dtype(compute_dtype).itemsize
    cost = pl.CostEstimate(
        flops=2 * M * K * N,
        transcendentals=0,
        bytes_accessed=(M * K + K * N) * itm + N * 4
        + M * N * jnp.dtype(out_dtype).itemsize,
    )

    out_p = pl.pallas_call(
        kernel,
        out_shape=jax.ShapeDtypeStruct((M_pad, N_pad), out_dtype),
        grid_spec=pltpu.PrefetchScalarGridSpec(
            num_scalar_prefetch=0,
            grid=grid,
            in_specs=[
                pl.BlockSpec((tile_m, tile_k), lambda i, j, k: (i, k)),
                pl.BlockSpec((tile_k, tile_n), lambda i, j, k: (k, j)),
                pl.BlockSpec((1, tile_n), lambda i, j, k: (0, j)),
            ],
            out_specs=pl.BlockSpec((tile_m, tile_n), lambda i, j, k: (i, j)),
            scratch_shapes=[pltpu.VMEM((tile_m, tile_n), jnp.float32)],
        ),
        compiler_params=pltpu.CompilerParams(
            dimension_semantics=("parallel", "parallel", "arbitrary"),
            vmem_limit_bytes=32 * 1024 * 1024,  # fits v7x's 64 MiB physical VMEM
        ),
        cost_estimate=cost,
    )(x_p, w_p, b_p)

    out = out_p[:M, :N]
    return out.reshape(*lead_shape, N)


# ---------------------------------------------------------------------------
# Pure-JAX reference
# ---------------------------------------------------------------------------
def _reference(x, weight, bias, lr_mul, activation):
    in_dim = weight.shape[1]
    scale = (1.0 / math.sqrt(in_dim)) * lr_mul
    out = x @ (weight * scale).T
    out = out + bias * lr_mul
    if activation:
        out = jnp.where(out >= 0.0, out, NEG_SLOPE * out) * SQRT2
    return out


if __name__ == "__main__":
    key = jax.random.PRNGKey(0)
    kx, kw, kb = jax.random.split(key, 3)

    # Small shapes consistent with the module: batch=2, seq=8, in_dim=32, out_dim=48.
    batch, seq, in_dim, out_dim = 2, 8, 32, 48
    lr_mul = 0.5

    x = jax.random.normal(kx, (batch, seq, in_dim), dtype=jnp.float32)
    # EqualLinear init: weight ~ randn / lr_mul, bias ~ bias_init (use small random).
    weight = jax.random.normal(kw, (out_dim, in_dim), dtype=jnp.float32) / lr_mul
    bias = jax.random.normal(kb, (out_dim,), dtype=jnp.float32) * 0.1

    fn_act = jax.jit(functools.partial(
        equal_linear, lr_mul=lr_mul, activation="fused_lrelu"))
    fn_lin = jax.jit(functools.partial(
        equal_linear, lr_mul=lr_mul, activation=None))

    out_act = fn_act(x, weight, bias)
    out_lin = fn_lin(x, weight, bias)
    jax.block_until_ready((out_act, out_lin))

    ref_act = _reference(x, weight, bias, lr_mul, True)
    ref_lin = _reference(x, weight, bias, lr_mul, False)

    assert out_act.shape == (batch, seq, out_dim), out_act.shape
    assert out_lin.shape == (batch, seq, out_dim), out_lin.shape
    assert jnp.allclose(out_act, ref_act, rtol=1e-5, atol=1e-5), "activation path mismatch"
    assert jnp.allclose(out_lin, ref_lin, rtol=1e-5, atol=1e-5), "linear path mismatch"

    # bf16 MXU operand path (v6e/v7x): f32 accumulation + f32 epilogue, looser tol.
    out_bf16 = jax.jit(functools.partial(
        equal_linear, lr_mul=lr_mul, activation="fused_lrelu",
        compute_dtype=jnp.bfloat16))(x, weight, bias)
    jax.block_until_ready(out_bf16)
    assert jnp.allclose(out_bf16, ref_act, rtol=5e-2, atol=5e-2), "bf16 path mismatch"

    print("KERNEL_OK")
</pallas_src>

<mosaic_0001>
module attributes {stable_mosaic.version = 11 : i64} {
  func.func @_equal_linear_kernel(%arg0: i32, %arg1: i32, %arg2: i32, %arg3: memref<16x128xf32, #tpu.memory_space<vmem>>, %arg4: memref<128x128xf32, #tpu.memory_space<vmem>>, %arg5: memref<1x128xf32, #tpu.memory_space<vmem>>, %arg6: memref<16x128xf32, #tpu.memory_space<vmem>>, %arg7: memref<16x128xf32, #tpu.memory_space<vmem>>) attributes {dimension_semantics = [#tpu.dimension_semantics<parallel>, #tpu.dimension_semantics<parallel>, #tpu.dimension_semantics<arbitrary>], iteration_bounds = array<i64: 1, 1, 1>, scalar_prefetch = 0 : i64, scratch_operands = 1 : i64, tpu.core_type = #tpu.core_type<tc>, window_params = [{transform_indices = @transform_0, window_bounds = array<i64: 16, 128>}, {transform_indices = @transform_1, window_bounds = array<i64: 128, 128>}, {transform_indices = @transform_2, window_bounds = array<i64: 1, 128>}, {transform_indices = @transform_3, window_bounds = array<i64: 16, 128>}]} {
    %c0_i32 = arith.constant 0 : i32
    %0 = arith.cmpi eq, %arg2, %c0_i32 : i32
    %1 = arith.extui %0 : i1 to i32
    %c0_i32_0 = arith.constant 0 : i32
    %2 = arith.cmpi ne, %1, %c0_i32_0 : i32
    scf.if %2 {
      %cst_10 = arith.constant 0.000000e+00 : f32
      %12 = vector.broadcast %cst_10 : f32 to vector<16x128xf32>
      %c0_11 = arith.constant 0 : index
      %c0_12 = arith.constant 0 : index
      %13 = vector.load %arg7[%c0_11, %c0_12] : memref<16x128xf32, #tpu.memory_space<vmem>>, vector<16x128xf32>
      tpu.vector_store %arg7[%c0_11, %c0_12], %12 {strides = array<i32>} : memref<16x128xf32, #tpu.memory_space<vmem>>, vector<16x128xf32>,
    } else {
    }
    %c0 = arith.constant 0 : index
    %c0_1 = arith.constant 0 : index
    %3 = vector.load %arg7[%c0, %c0_1] : memref<16x128xf32, #tpu.memory_space<vmem>>, vector<16x128xf32>
    %c0_2 = arith.constant 0 : index
    %c0_3 = arith.constant 0 : index
    %4 = vector.load %arg3[%c0_2, %c0_3] : memref<16x128xf32, #tpu.memory_space<vmem>>, vector<16x128xf32>
    %c0_4 = arith.constant 0 : index
    %c0_5 = arith.constant 0 : index
    %5 = vector.load %arg4[%c0_4, %c0_5] : memref<128x128xf32, #tpu.memory_space<vmem>>, vector<128x128xf32>
    %cst = arith.constant dense<0.000000e+00> : vector<16x128xf32>
    %6 = tpu.matmul %4, %5, %cst {dimension_numbers = #tpu.dot_dimension_numbers<[1], [0], [0], [1], [0, 0, 1, 1], [], []>} : vector<16x128xf32>, vector<128x128xf32>, vector<16x128xf32> -> vector<16x128xf32>
    %7 = arith.addf %3, %6 : vector<16x128xf32>
    %c0_6 = arith.constant 0 : index
    %c0_7 = arith.constant 0 : index
    %8 = vector.load %arg7[%c0_6, %c0_7] : memref<16x128xf32, #tpu.memory_space<vmem>>, vector<16x128xf32>
    tpu.vector_store %arg7[%c0_6, %c0_7], %7 {strides = array<i32>} : memref<16x128xf32, #tpu.memory_space<vmem>>, vector<16x128xf32>,
    %c0_i32_8 = arith.constant 0 : i32
    %9 = arith.cmpi eq, %arg2, %c0_i32_8 : i32
    %10 = arith.extui %9 : i1 to i32
    %c0_i32_9 = arith.constant 0 : i32
    %11 = arith.cmpi ne, %10, %c0_i32_9 : i32
    scf.if %11 {
      %c0_10 = arith.constant 0 : index
      %c0_11 = arith.constant 0 : index
      %12 = vector.load %arg7[%c0_10, %c0_11] : memref<16x128xf32, #tpu.memory_space<vmem>>, vector<16x128xf32>
      %c0_12 = arith.constant 0 : index
      %c0_13 = arith.constant 0 : index
      %13 = vector.load %arg5[%c0_12, %c0_13] : memref<1x128xf32, #tpu.memory_space<vmem>>, vector<1x128xf32>
      %14 = vector.broadcast %13 : vector<1x128xf32> to vector<16x128xf32>
      %15 = arith.addf %12, %14 : vector<16x128xf32>
      %cst_14 = arith.constant 0.000000e+00 : f32
      %16 = vector.broadcast %cst_14 : f32 to vector<16x128xf32>
      %17 = arith.cmpf oge, %15, %16 : vector<16x128xf32>
      %cst_15 = arith.constant 2.000000e-01 : f32
      %18 = vector.broadcast %cst_15 : f32 to vector<16x128xf32>
      %19 = arith.mulf %18, %15 : vector<16x128xf32>
      %20 = arith.select %17, %15, %19 : vector<16x128xi1>, vector<16x128xf32>
      %cst_16 = arith.constant 1.41421354 : f32
      %21 = vector.broadcast %cst_16 : f32 to vector<16x128xf32>
      %22 = arith.mulf %20, %21 : vector<16x128xf32>
      %c0_17 = arith.constant 0 : index
      %c0_18 = arith.constant 0 : index
      %23 = vector.load %arg6[%c0_17, %c0_18] : memref<16x128xf32, #tpu.memory_space<vmem>>, vector<16x128xf32>
      tpu.vector_store %arg6[%c0_17, %c0_18], %22 {strides = array<i32>} : memref<16x128xf32, #tpu.memory_space<vmem>>, vector<16x128xf32>,
    } else {
    }
    return
  }
  func.func @transform_0(%arg0: i32, %arg1: i32, %arg2: i32) -> (i32, i32) {
    %c0_i32 = arith.constant 0 : i32
    return %arg0, %arg2 : i32, i32
  }
  func.func @transform_1(%arg0: i32, %arg1: i32, %arg2: i32) -> (i32, i32) {
    %c0_i32 = arith.constant 0 : i32
    return %arg2, %arg1 : i32, i32
  }
  func.func @transform_2(%arg0: i32, %arg1: i32, %arg2: i32) -> (i32, i32) {
    %c0_i32 = arith.constant 0 : i32
    %c0_i32_0 = arith.constant 0 : i32
    return %c0_i32, %arg1 : i32, i32
  }
  func.func @transform_3(%arg0: i32, %arg1: i32, %arg2: i32) -> (i32, i32) {
    %c0_i32 = arith.constant 0 : i32
    return %arg0, %arg1 : i32, i32
  }
}

</mosaic_0001>

<bundles_post_ra>
// kernel: equal_linear.1
= control target key start
LH: loop header
LB: loop body
LE: loop exit
PB: predicated region body
PF: predicated region fallthrough
CT: control target
= control target key end

     0   :  { %s284_s1 = inlined_call_operand.vmem [shape: f32[128,128], index: 1, kind: input, shape index: {}]   ;;  %s285_s0 = inlined_call_operand.vmem [shape: f32[16,128], index: 0, kind: input, shape index: {}]   ;;  %s286_s2 = inlined_call_operand.vmem [shape: f32[1,128], index: 2, kind: input, shape index: {}]   ;;  %s287_s3 = inlined_call_operand.vmem [shape: f32[16,128], index: 3, kind: output, shape index: {}]  }
   0x1   :  { %v39_v0 = vld [vmem:[%s284_s1 + $0x78] sm:$0xff]  ;;  %v38_v1 = vld [vmem:[%s284_s1 + $0x70] sm:$0xff]  ;;  %v37_v2 = vld [vmem:[%s284_s1 + $0x68] sm:$0xff] }
   0x2   :  { %166 = vmatprep.subr.mxu0 %v39_v0  ;;  %v36_v3 = vld [vmem:[%s284_s1 + $0x60] sm:$0xff]  ;;  %v35_v5 = vld [vmem:[%s284_s1 + $0x58] sm:$0xff]  ;;  %v34_v6 = vld [vmem:[%s284_s1 + $0x50] sm:$0xff] }
   0x3   :  { %167 = vmatpush3.msra.mxu0 %v39_v0  ;;  %v22_v4 = vld [vmem:[%s285_s0] sm:$0xff]  ;;  %v33_v7 = vld [vmem:[%s284_s1 + $0x48] sm:$0xff]  ;;  %v31_v9 = vld [vmem:[%s284_s1 + $0x38] sm:$0xff] }
   0x4   :  { %168 = vmatprep.subr.mxu0 %v38_v1  ;;  %198 = vmatprep.mubr.f32.mxu0 %v22_v4  ;;  %v32_v8 = vld [vmem:[%s284_s1 + $0x40] sm:$0xff]  ;;  %v30_v10 = vld [vmem:[%s284_s1 + $0x30] sm:$0xff]  ;;  %v29_v11 = vld [vmem:[%s284_s1 + $0x28] sm:$0xff] }
   0x5   :  { %169 = vmatpush3.msra.mxu0 %v38_v1  ;;  %v28_v12 = vld [vmem:[%s284_s1 + $0x20] sm:$0xff]  ;;  %v27_v13 = vld [vmem:[%s284_s1 + $0x18] sm:$0xff]  ;;  %v26_v14 = vld [vmem:[%s284_s1 + $0x10] sm:$0xff] }
   0x6   :  { %170 = vmatprep.subr.mxu0 %v37_v2  ;;  %v25_v15 = vld [vmem:[%s284_s1 + $0x8] sm:$0xff]  ;;  %v24_v16 = vld [vmem:[%s284_s1] sm:$0xff] }
   0x7   :  { %171 = vmatpush3.msra.mxu0 %v37_v2  ;;  %v23_v17 = vld [vmem:[%s285_s0 + $0x8] sm:$0xff]  ;;  %v147_v18 = vld [vmem:[%s286_s2] ss:$0 sm:$0xff] }
   0x8   :  { %172 = vmatprep.subr.mxu0 %v36_v3 }
   0x9   :  { %173 = vmatpush3.msra.mxu0 %v36_v3 }
   0xa   :  { %174 = vmatprep.subr.mxu0 %v35_v5 }
   0xb   :  { %175 = vmatpush3.msra.mxu0 %v35_v5 }
   0xc   :  { %176 = vmatprep.subr.mxu0 %v34_v6 }
   0xd   :  { %177 = vmatpush3.msra.mxu0 %v34_v6 }
   0xe   :  { %178 = vmatprep.subr.mxu0 %v33_v7 }
   0xf   :  { %179 = vmatpush3.msra.mxu0 %v33_v7 }
  0x10   :  { %180 = vmatprep.subr.mxu0 %v32_v8 }
  0x11   :  { %181 = vmatpush3.msra.mxu0 %v32_v8 }
  0x12   :  { %182 = vmatprep.subr.mxu0 %v31_v9 }
  0x13   :  { %183 = vmatpush3.msra.mxu0 %v31_v9 }
  0x14   :  { %184 = vmatprep.subr.mxu0 %v30_v10 }
  0x15   :  { %185 = vmatpush3.msra.mxu0 %v30_v10 }
  0x16   :  { %186 = vmatprep.subr.mxu0 %v29_v11 }
  0x17   :  { %187 = vmatpush3.msra.mxu0 %v29_v11 }
  0x18   :  { %188 = vmatprep.subr.mxu0 %v28_v12 }
  0x19   :  { %189 = vmatpush3.msra.mxu0 %v28_v12 }
  0x1a   :  { %190 = vmatprep.subr.mxu0 %v27_v13 }
  0x1b   :  { %191 = vmatpush3.msra.mxu0 %v27_v13 }
  0x1c   :  { %192 = vmatprep.subr.mxu0 %v26_v14 }
  0x1d   :  { %193 = vmatpush3.msra.mxu0 %v26_v14 }
  0x1e   :  { %194 = vmatprep.subr.mxu0 %v25_v15 }
  0x1f   :  { %195 = vmatpush3.msra.mxu0 %v25_v15 }
  0x20   :  { %196 = vmatprep.subr.mxu0 %v24_v16 }
  0x21   :  { %197 = vmatpush3.msra.mxu0 %v24_v16 }
  0x22   :  { %199 = vmatmul.mubr.f32.vlgmr.msra.gmra.mxu0 %v23_v17 }
  0xe2   :  { %v200_v19 = vpop.f32.mrf.mxu0 }
  0xe3   :  { %v132_v20 = vadd.f32 %v200_v19, %v147_v18 }
  0xe4   :  { %v106_v21 = vpop.f32.mrf.mxu0 }
  0xe5   :  { %vm134_vm0 = vcmp.ge.f32.partialorder %v132_v20, 0.0  ;;  %v136_v22 = vmul.f32 0.2, %v132_v20  ;;  %v131_v23 = vadd.f32 %v147_v18, %v106_v21 }
  0xe7   :  { %v138_v24 = vsel %vm134_vm0, %v132_v20, %v136_v22  ;;  %vm133_vm1 = vcmp.ge.f32.partialorder %v131_v23, 0.0  ;;  %v135_v25 = vmul.f32 0.2, %v131_v23 }
  0xe8   :  { %v140_v26 = vmul.f32 1.4142135, %v138_v24 }
  0xe9   :  { %v137_v27 = vsel %vm133_vm1, %v131_v23, %v135_v25 }
  0xea   :  { %142 = vst [vmem:[%s287_s3 + $0x8] sm:$0xff] %v140_v26  ;;  %v139_v28 = vmul.f32 1.4142135, %v137_v27 }
  0xec   :  { %141 = vst [vmem:[%s287_s3] sm:$0xff] %v139_v28 }

</bundles_post_ra>
